<compile_context>
chip_gen: v7x
topology: tpu7x:2x2x1
jax: 0.10.0
libtpu: 0.0.40
codegen_flags: <defaults>
</compile_context>

<pallas_src>
import jax
import jax.numpy as jnp
from jax.experimental import pallas as pl
from jax.experimental.pallas import tpu as pltpu


def text_encoder_kernel(ids_ref, wf_ref, b1_ref, w2_ref, b2_ref, out_ref):
    ids = ids_ref[...]                                   # (TB, T) int32
    TB, T = ids.shape
    V = wf_ref.shape[0]

    # Unscaled one-hot counts via T static 2-D compares (the 1/T is folded into wf).
    iota_v = jax.lax.broadcasted_iota(jnp.int32, (TB, V), 1)
    counts = jnp.zeros((TB, V), jnp.float32)
    for t in range(T):                                   # T is small & static -> unrolled VPU adds
        counts = counts + (ids[:, t:t + 1] == iota_v).astype(jnp.float32)

    # Fused embedding-mean + fc1:  h = counts @ ((emb @ w1)/T) + b1 ; ReLU
    h = jnp.dot(counts, wf_ref[...], preferred_element_type=jnp.float32) + b1_ref[...]
    h = jnp.maximum(h, 0.0)

    # fc2 (weights/bias zero-padded to 128 lanes in the wrapper -> lane-dense store)
    y = jnp.dot(h, w2_ref[...], preferred_element_type=jnp.float32) + b2_ref[...]

    # F.normalize(dim=-1): y / max(||y||, 1e-12)  ==  y * rsqrt(max(sum(y^2), 1e-24))
    ss = jnp.sum(y * y, axis=-1, keepdims=True)          # padded cols are zero -> exact
    out_ref[...] = y * jax.lax.rsqrt(jnp.maximum(ss, 1e-24))


def text_encoder(ids, emb, w1, b1, w2, b2, *, block_b=512):
    B, T = ids.shape
    V, E = emb.shape
    H = w1.shape[1]
    O = w2.shape[1]
    OP = 128                                             # lane-dense padded output width

    # Algebraic fusion of the embedding matmul into fc1 (linear ops, no nonlinearity between).
    w_fused = jnp.dot(emb, w1, precision=jax.lax.Precision.HIGHEST) * (1.0 / T)   # (V, H)

    # Zero-pad fc2 weight/bias so the output block is 128 lanes wide (unmasked vst).
    w2p = jnp.zeros((H, OP), w2.dtype).at[:, :O].set(w2)
    b2p = jnp.zeros((1, OP), b2.dtype).at[:, :O].set(b2)

    tb = min(block_b, B)
    grid = (pl.cdiv(B, tb),)

    out_padded = pl.pallas_call(
        text_encoder_kernel,
        out_shape=jax.ShapeDtypeStruct((B, OP), jnp.float32),
        grid=grid,
        in_specs=[
            pl.BlockSpec((tb, T), lambda i: (i, 0)),     # ids      — tiled over batch
            pl.BlockSpec((V, H), lambda i: (0, 0)),      # fused (emb @ w1) / T
            pl.BlockSpec((1, H), lambda i: (0, 0)),      # b1
            pl.BlockSpec((H, OP), lambda i: (0, 0)),     # w2 (zero-padded to 128 lanes)
            pl.BlockSpec((1, OP), lambda i: (0, 0)),     # b2 (zero-padded to 128 lanes)
        ],
        out_specs=pl.BlockSpec((tb, OP), lambda i: (i, 0)),
        compiler_params=pltpu.CompilerParams(
            dimension_semantics=("parallel",)),          # v7x: 2 TCs split the batch blocks
    )(ids, w_fused, b1, w2p, b2p)

    return out_padded[:, :O]


def reference(ids, emb, w1, b1, w2, b2):
    x = jnp.take(emb, ids, axis=0)                       # (B, T, E)
    x = jnp.mean(x, axis=1)                              # (B, E)
    h = jnp.maximum(
        jnp.dot(x, w1, precision=jax.lax.Precision.HIGHEST) + b1, 0.0)
    y = jnp.dot(h, w2, precision=jax.lax.Precision.HIGHEST) + b2
    n = jnp.sqrt(jnp.sum(y * y, axis=-1, keepdims=True))
    return y / jnp.maximum(n, 1e-12)


if __name__ == "__main__":
    # vocab from the chars of the labels 'four' / 'nine'
    chars = sorted(list(set("four" + "nine")))           # ['e','f','i','n','o','r','u']
    stoi = {c: i for i, c in enumerate(chars)}
    vocab_size = len(chars)                              # 7
    embed_dim = 128
    hidden = 64
    out_dim = 10

    # deterministic parameter init
    key = jax.random.PRNGKey(0)
    k_emb, k_w1, k_b1, k_w2, k_b2, _ = jax.random.split(key, 6)
    emb = jax.random.normal(k_emb, (vocab_size, embed_dim), jnp.float32)
    # Linear weights stored transposed: (in, out)
    w1 = jax.random.normal(k_w1, (embed_dim, hidden), jnp.float32) * 0.05
    b1 = jax.random.normal(k_b1, (1, hidden), jnp.float32) * 0.05
    w2 = jax.random.normal(k_w2, (hidden, out_dim), jnp.float32) * 0.05
    b2 = jax.random.normal(k_b2, (1, out_dim), jnp.float32) * 0.05

    # batch of 2 text labels: "four", "nine"  -> (B=2, T=4) int32 token ids
    labels = ["four", "nine"]
    ids = jnp.array([[stoi[c] for c in s] for s in labels], dtype=jnp.int32)

    out = text_encoder(ids, emb, w1, b1, w2, b2)
    out = jax.block_until_ready(out)

    ref = reference(ids, emb, w1, b1, w2, b2)
    assert out.shape == (2, 10)
    assert jnp.allclose(out, ref, atol=1e-5, rtol=1e-5), (out, ref)

    print("KERNEL_OK")
</pallas_src>

<mosaic_0001>
module attributes {stable_mosaic.version = 11 : i64} {
  func.func @text_encoder_kernel(%arg0: i32, %arg1: memref<2x4xi32, #tpu.memory_space<vmem>>, %arg2: memref<7x64xf32, #tpu.memory_space<vmem>>, %arg3: memref<1x64xf32, #tpu.memory_space<vmem>>, %arg4: memref<64x128xf32, #tpu.memory_space<vmem>>, %arg5: memref<1x128xf32, #tpu.memory_space<vmem>>, %arg6: memref<2x128xf32, #tpu.memory_space<vmem>>) attributes {dimension_semantics = [#tpu.dimension_semantics<parallel>], iteration_bounds = array<i64: 1>, scalar_prefetch = 0 : i64, scratch_operands = 0 : i64, tpu.core_type = #tpu.core_type<tc>, window_params = [{transform_indices = @transform_0, window_bounds = array<i64: 2, 4>}, {pipeline_mode = #tpu.pipeline_mode<synchronous>, transform_indices = @transform_1, window_bounds = array<i64: 7, 64>}, {pipeline_mode = #tpu.pipeline_mode<synchronous>, transform_indices = @transform_2, window_bounds = array<i64: 1, 64>}, {pipeline_mode = #tpu.pipeline_mode<synchronous>, transform_indices = @transform_3, window_bounds = array<i64: 64, 128>}, {pipeline_mode = #tpu.pipeline_mode<synchronous>, transform_indices = @transform_4, window_bounds = array<i64: 1, 128>}, {transform_indices = @transform_5, window_bounds = array<i64: 2, 128>}]} {
    %c0 = arith.constant 0 : index
    %c0_0 = arith.constant 0 : index
    %0 = vector.load %arg1[%c0, %c0_0] : memref<2x4xi32, #tpu.memory_space<vmem>>, vector<2x4xi32>
    %1 = tpu.iota {dimensions = array<i32: 1>} : vector<2x7xi32>
    %cst = arith.constant 0.000000e+00 : f32
    %2 = vector.broadcast %cst : f32 to vector<2x7xf32>
    %3 = vector.extract_strided_slice %0 {offsets = [0, 0], sizes = [2, 1], strides = [1, 1]} : vector<2x4xi32> to vector<2x1xi32>
    %4 = vector.broadcast %3 : vector<2x1xi32> to vector<2x7xi32>
    %5 = arith.cmpi eq, %4, %1 : vector<2x7xi32>
    %6 = arith.extui %5 : vector<2x7xi1> to vector<2x7xi32>
    %7 = arith.sitofp %6 : vector<2x7xi32> to vector<2x7xf32>
    %8 = arith.addf %2, %7 : vector<2x7xf32>
    %9 = vector.extract_strided_slice %0 {offsets = [0, 1], sizes = [2, 1], strides = [1, 1]} : vector<2x4xi32> to vector<2x1xi32>
    %10 = vector.broadcast %9 : vector<2x1xi32> to vector<2x7xi32>
    %11 = arith.cmpi eq, %10, %1 : vector<2x7xi32>
    %12 = arith.extui %11 : vector<2x7xi1> to vector<2x7xi32>
    %13 = arith.sitofp %12 : vector<2x7xi32> to vector<2x7xf32>
    %14 = arith.addf %8, %13 : vector<2x7xf32>
    %15 = vector.extract_strided_slice %0 {offsets = [0, 2], sizes = [2, 1], strides = [1, 1]} : vector<2x4xi32> to vector<2x1xi32>
    %16 = vector.broadcast %15 : vector<2x1xi32> to vector<2x7xi32>
    %17 = arith.cmpi eq, %16, %1 : vector<2x7xi32>
    %18 = arith.extui %17 : vector<2x7xi1> to vector<2x7xi32>
    %19 = arith.sitofp %18 : vector<2x7xi32> to vector<2x7xf32>
    %20 = arith.addf %14, %19 : vector<2x7xf32>
    %21 = vector.extract_strided_slice %0 {offsets = [0, 3], sizes = [2, 1], strides = [1, 1]} : vector<2x4xi32> to vector<2x1xi32>
    %22 = vector.broadcast %21 : vector<2x1xi32> to vector<2x7xi32>
    %23 = arith.cmpi eq, %22, %1 : vector<2x7xi32>
    %24 = arith.extui %23 : vector<2x7xi1> to vector<2x7xi32>
    %25 = arith.sitofp %24 : vector<2x7xi32> to vector<2x7xf32>
    %26 = arith.addf %20, %25 : vector<2x7xf32>
    %c0_1 = arith.constant 0 : index
    %c0_2 = arith.constant 0 : index
    %27 = vector.load %arg2[%c0_1, %c0_2] : memref<7x64xf32, #tpu.memory_space<vmem>>, vector<7x64xf32>
    %cst_3 = arith.constant dense<0.000000e+00> : vector<2x64xf32>
    %28 = tpu.matmul %26, %27, %cst_3 {dimension_numbers = #tpu.dot_dimension_numbers<[1], [0], [0], [1], [0, 0, 1, 1], [], []>} : vector<2x7xf32>, vector<7x64xf32>, vector<2x64xf32> -> vector<2x64xf32>
    %c0_4 = arith.constant 0 : index
    %c0_5 = arith.constant 0 : index
    %29 = vector.load %arg3[%c0_4, %c0_5] : memref<1x64xf32, #tpu.memory_space<vmem>>, vector<1x64xf32>
    %30 = vector.broadcast %29 : vector<1x64xf32> to vector<2x64xf32>
    %31 = arith.addf %28, %30 : vector<2x64xf32>
    %cst_6 = arith.constant 0.000000e+00 : f32
    %32 = vector.broadcast %cst_6 : f32 to vector<2x64xf32>
    %33 = arith.maximumf %31, %32 : vector<2x64xf32>
    %c0_7 = arith.constant 0 : index
    %c0_8 = arith.constant 0 : index
    %34 = vector.load %arg4[%c0_7, %c0_8] : memref<64x128xf32, #tpu.memory_space<vmem>>, vector<64x128xf32>
    %cst_9 = arith.constant dense<0.000000e+00> : vector<2x128xf32>
    %35 = tpu.matmul %33, %34, %cst_9 {dimension_numbers = #tpu.dot_dimension_numbers<[1], [0], [0], [1], [0, 0, 1, 1], [], []>} : vector<2x64xf32>, vector<64x128xf32>, vector<2x128xf32> -> vector<2x128xf32>
    %c0_10 = arith.constant 0 : index
    %c0_11 = arith.constant 0 : index
    %36 = vector.load %arg5[%c0_10, %c0_11] : memref<1x128xf32, #tpu.memory_space<vmem>>, vector<1x128xf32>
    %37 = vector.broadcast %36 : vector<1x128xf32> to vector<2x128xf32>
    %38 = arith.addf %35, %37 : vector<2x128xf32>
    %39 = arith.mulf %38, %38 : vector<2x128xf32>
    %cst_12 = arith.constant dense<0.000000e+00> : vector<2xf32>
    %40 = vector.multi_reduction <add>, %39, %cst_12 [1] : vector<2x128xf32> to vector<2xf32>
    %41 = vector.shape_cast %40 : vector<2xf32> to vector<2x1xf32>
    %cst_13 = arith.constant 1.000000e-24 : f32
    %42 = vector.broadcast %cst_13 : f32 to vector<2x1xf32>
    %43 = arith.maximumf %41, %42 : vector<2x1xf32>
    %44 = math.rsqrt %43 : vector<2x1xf32>
    %45 = vector.broadcast %44 : vector<2x1xf32> to vector<2x128xf32>
    %46 = arith.mulf %38, %45 : vector<2x128xf32>
    %c0_14 = arith.constant 0 : index
    %c0_15 = arith.constant 0 : index
    %47 = vector.load %arg6[%c0_14, %c0_15] : memref<2x128xf32, #tpu.memory_space<vmem>>, vector<2x128xf32>
    tpu.vector_store %arg6[%c0_14, %c0_15], %46 {strides = array<i32>} : memref<2x128xf32, #tpu.memory_space<vmem>>, vector<2x128xf32>,
    return
  }
  func.func @transform_0(%arg0: i32) -> (i32, i32) {
    %c0_i32 = arith.constant 0 : i32
    %c0_i32_0 = arith.constant 0 : i32
    return %arg0, %c0_i32 : i32, i32
  }
  func.func @transform_1(%arg0: i32) -> (i32, i32) {
    %c0_i32 = arith.constant 0 : i32
    %c0_i32_0 = arith.constant 0 : i32
    %c0_i32_1 = arith.constant 0 : i32
    return %c0_i32, %c0_i32_0 : i32, i32
  }
  func.func @transform_2(%arg0: i32) -> (i32, i32) {
    %c0_i32 = arith.constant 0 : i32
    %c0_i32_0 = arith.constant 0 : i32
    %c0_i32_1 = arith.constant 0 : i32
    return %c0_i32, %c0_i32_0 : i32, i32
  }
  func.func @transform_3(%arg0: i32) -> (i32, i32) {
    %c0_i32 = arith.constant 0 : i32
    %c0_i32_0 = arith.constant 0 : i32
    %c0_i32_1 = arith.constant 0 : i32
    return %c0_i32, %c0_i32_0 : i32, i32
  }
  func.func @transform_4(%arg0: i32) -> (i32, i32) {
    %c0_i32 = arith.constant 0 : i32
    %c0_i32_0 = arith.constant 0 : i32
    %c0_i32_1 = arith.constant 0 : i32
    return %c0_i32, %c0_i32_0 : i32, i32
  }
  func.func @transform_5(%arg0: i32) -> (i32, i32) {
    %c0_i32 = arith.constant 0 : i32
    %c0_i32_0 = arith.constant 0 : i32
    return %arg0, %c0_i32 : i32, i32
  }
}

</mosaic_0001>

<bundles_post_ra>
// kernel: tpu_custom_call.1
= control target key start
LH: loop header
LB: loop body
LE: loop exit
PB: predicated region body
PF: predicated region fallthrough
CT: control target
= control target key end

     0   :  { %10 = vsyncpa [#allocation3], 0  ;;  %s557_s0 = inlined_call_operand.hbm [shape: s32[2,4], index: 0, kind: input, shape index: {}]   ;;  %s558_s1 = inlined_call_operand.hbm [shape: f32[7,64], index: 1, kind: input, shape index: {}]   ;;  %s559_s2 = inlined_call_operand.vmem [shape: f32[1,64], index: 2, kind: input, shape index: {}]   ;;  %s560_s3 = inlined_call_operand.hbm [shape: f32[64,128], index: 3, kind: input, shape index: {}]   ;;  %s561_s4 = inlined_call_operand.vmem [shape: f32[1,128], index: 4, kind: input, shape index: {}]   ;;  %s562_s5 = inlined_call_operand.hbm [shape: f32[2,128], index: 5, kind: output, shape index: {}]  }
   0x1   :  { %11 = vsyncpa [#allocation6], 0 }
   0x2   :  { %12 = vsyncpa [#allocation4], 0  ;;  %s460_s18 = smov [#allocation5]   ;;  %s461_s20 = smov [#allocation2]  }
   0x3   :  { %s29_s19 = sshll.u32 %s460_s18, 4  ;;  %s19_s21 = sshll.u32 %s461_s20, 4  ;;  %s30_s19 = int_to_ptr.vmem [resolvable:$true] %s29_s19  ;;  %s20_s21 = int_to_ptr.vmem [resolvable:$true] %s19_s21 }
   0x4   :  { %s366_s24 = scalar_lea.hbm %s558_s1, 128 }
   0x5   :  { %p367_p0 = scmp.ne.s32.totalorder %s558_s1, %s366_s24  ;;  %p370_p1 = scmp.lt.u32.totalorder %s366_s24, %s558_s1 }
   0x7   :  { %p372_p2 = pnand %p370_p1, %p367_p0 }
   0x9   :  { %375 = shalt.err (!%p372_p2)
}
   0xa   :  { %s376_s29 = scalar_lea.vmem %s30_s19, 128  ;;  %p381_p4 = scmp.lt.s32.totalorder %s30_s19, %s30_s19 }
   0xb   :  { %p377_p3 = scmp.ne.s32.totalorder %s30_s19, %s376_s29  ;;  %p382_p5 = scmp.lt.s32.totalorder %s376_s29, %s376_s29 }
   0xd   :  { %p383_p6 = por %p382_p5, %p381_p4 }
   0xf   :  { %p384_p7 = pnand %p383_p6, %p377_p3 }
  0x11   :  { %387 = shalt.err (!%p384_p7)
}
  0x12   :  { %32 = dma.hbm_to_vmem [thread:$0]  %s558_s1, 128, %s30_s19, [#allocation6]  }
  0x13   :  { %s388_s9 = scalar_lea.hbm %s557_s0, 32 }
  0x14   :  { %p389_p8 = scmp.ne.s32.totalorder %s557_s0, %s388_s9  ;;  %p392_p9 = scmp.lt.u32.totalorder %s388_s9, %s557_s0 }
  0x16   :  { %p394_p10 = pnand %p392_p9, %p389_p8 }
  0x18   :  { %397 = shalt.err (!%p394_p10)
}
  0x19   :  { %s398_s14 = scalar_lea.vmem %s20_s21, 32  ;;  %p403_p12 = scmp.lt.s32.totalorder %s20_s21, %s20_s21 }
  0x1a   :  { %p399_p11 = scmp.ne.s32.totalorder %s20_s21, %s398_s14  ;;  %p404_p13 = scmp.lt.s32.totalorder %s398_s14, %s398_s14 }
  0x1c   :  { %p405_p0 = por %p404_p13, %p403_p12 }
  0x1e   :  { %p406_p1 = pnand %p405_p0, %p399_p11 }
  0x20   :  { %409 = shalt.err (!%p406_p1)
}
  0x21   :  { %22 = dma.hbm_to_vmem [thread:$0]  %s557_s0, 32, %s20_s21, [#allocation3]  }
  0x22   :  { %s462_s16 = smov [#allocation7]   ;;  %s410_s20 = scalar_lea.hbm %s560_s3, 1024 }
  0x23   :  { %s40_s17 = sshll.u32 %s462_s16, 4  ;;  %p411_p2 = scmp.ne.s32.totalorder %s560_s3, %s410_s20  ;;  %s41_s17 = int_to_ptr.vmem [resolvable:$true] %s40_s17 }
  0x24   :  { %p414_p3 = scmp.lt.u32.totalorder %s410_s20, %s560_s3 }
  0x26   :  { %p416_p4 = pnand %p414_p3, %p411_p2 }
  0x28   :  { %419 = shalt.err (!%p416_p4)
}
  0x29   :  { %s420_s26 = scalar_lea.vmem %s41_s17, 1024  ;;  %p425_p6 = scmp.lt.s32.totalorder %s41_s17, %s41_s17 }
  0x2a   :  { %p421_p5 = scmp.ne.s32.totalorder %s41_s17, %s420_s26  ;;  %p426_p7 = scmp.lt.s32.totalorder %s420_s26, %s420_s26 }
  0x2c   :  { %p427_p8 = por %p426_p7, %p425_p6 }
  0x2e   :  { %p428_p9 = pnand %p427_p8, %p421_p5 }
  0x30   :  { %431 = shalt.err (!%p428_p9)
}
  0x31   :  { %s463_s0 = smov 128   ;;  %s464_s21 = smov 8  }
  0x32   :  { %46 = dma.hbm_to_vmem [thread:$0]  %s560_s3, 1024, %s41_s17, [#allocation6], %s463_s0, %s463_s0, %s464_s21  }
  0x33   :  { %454 = dma.done.wait [#allocation3], 32  }
  0x34   :  { %455 = vsyncadd [#allocation3], 4294967264 }
  0x35   :  { %456 = dma.done.wait [#allocation6], 1152  }
  0x36   :  { %457 = vsyncadd [#allocation6], 4294966144  ;;  %v465_v0 = vmov 0   ;;  %v466_v1 = vmov 2   ;;  %v467_v2 = vmov 0.0   ;;  %v468_v4 = vmov 1  }
  0x37   :  { %359 = vset.pattern.permute.xlu0 %v465_v0  ;;  %361 = vset.pattern.permute.xlu1 %v466_v1  ;;  %v58_v3 = vld [vmem:[#allocation2] sm:$0x3]  ;;  %v469_v5 = vmov 3   ;;  %v89_v6 = vld [vmem:[#allocation5] sm:$0x7f]  ;;  %vm101_vm0 = vcmask 1046528   ;;  %v59_v17 = vlaneseq }
  0x38   :  { %310 = vmatprep.subr.mxu0 %v467_v2  ;;  %62 = vperm.xlu0 %359, %v58_v3   ;;  %vm470_vm1 = vmmov 0   ;;  %v176_v7 = vld [vmem:[#allocation7] sm:$0xff]  ;;  %v177_v8 = vld [vmem:[#allocation7 + $0x8] sm:$0xff]  ;;  %v178_v9 = vld [vmem:[#allocation7 + $0x10] sm:$0xff]  ;;  %v471_v10 = vmov 0.0|0.0   ;;  %vm97_vm6 = vcmask 56320  }
  0x39   :  { %76 = vperm.xlu1 %361, %v58_v3   ;;  %311 = vmatpush3.msk.msra.mxu0 %vm101_vm0, %v89_v6  ;;  %v335_v11 = vpack.c.bf16 %v177_v8, %v176_v7  ;;  %v179_v12 = vld [vmem:[#allocation7 + $0x18] sm:$0xff]  ;;  %v180_v14 = vld [vmem:[#allocation7 + $0x20] sm:$0xff]  ;;  %v181_v15 = vld [vmem:[#allocation7 + $0x28] sm:$0xff]  ;;  %v60_v18 = vand.u32 127, %v59_v17  ;;  %vm191_vm7 = vcmask 523264   ;;  %vm266_vm8 = vcmask 1041408  }
  0x3a   :  { %312 = vmatprep.mubr.msk.f32.mxu0 %vm470_vm1, %v467_v2  ;;  %331 = vmatprep.mubr.msk.f32.mxu1 %vm470_vm1, %v467_v2  ;;  %v338_v13 = vpack.c.bf16 %v179_v12, %v178_v9  ;;  %v341_v16 = vpack.c.bf16 %v181_v15, %v180_v14  ;;  %v182_v30 = vld [vmem:[#allocation7 + $0x30] sm:$0xff]  ;;  %v183_v31 = vld [vmem:[#allocation7 + $0x38] sm:$0xff] }
  0x3b   :  { %334 = vmatprep.subr.bf16.mxu1 %v471_v10  ;;  %v344_v32 = vpack.c.bf16 %v183_v31, %v182_v30  ;;  %v294_v33 = vld [vmem:[%s559_s2] ss:$0 sm:$0xff]  ;;  %s472_s2 = smov [#allocation8]  }
  0x3c   :  { %360 = vset.pattern.permute.xlu0 %v468_v4  ;;  %336 = vmatpush3.bf16.msra.mxu1 %v335_v11  ;;  %v297_v38 = vld [vmem:[%s561_s4] ss:$0 sm:$0xff]  ;;  %s280_s7 = sshll.u32 %s472_s2, 4  ;;  %s281_s7 = int_to_ptr.vmem [resolvable:$true] %s280_s7 }
  0x3d   :  { %362 = vset.pattern.permute.xlu1 %v469_v5  ;;  %69 = vperm.xlu0 %360, %v58_v3   ;;  %s432_s8 = scalar_lea.vmem %s281_s7, 32  ;;  %p437_p11 = scmp.lt.s32.totalorder %s281_s7, %s281_s7 }
  0x3e   :  { %83 = vperm.xlu1 %362, %v58_v3   ;;  %337 = vmatprep.subr.bf16.mxu1 %v471_v10  ;;  %p433_p10 = scmp.ne.s32.totalorder %s281_s7, %s432_s8  ;;  %p438_p12 = scmp.lt.s32.totalorder %s432_s8, %s432_s8 }
  0x40   :  { %339 = vmatpush3.bf16.msra.mxu1 %v338_v13  ;;  %p439_p13 = por %p438_p12, %p437_p11 }
  0x41   :  { %363 = vset.pattern.permute.xlu0 %v469_v5  ;;  %340 = vmatprep.subr.bf16.mxu1 %v471_v10 }
  0x42   :  { %p440_p0 = pnand %p439_p13, %p433_p10 }
  0x44   :  { %342 = vmatpush3.bf16.msra.mxu1 %v341_v16 }
  0x45   :  { %343 = vmatprep.subr.bf16.mxu1 %v471_v10 }
  0x48   :  { %345 = vmatpush3.bf16.msra.mxu1 %v344_v32 }
  0xb7   :  { %v63_v19 = vpop.permute.xlu0 %62 }
  0xb8   :  { %v77_v20 = vpop.permute.xlu1 %76  ;;  %vm64_vm2 = vcmp.eq.s32.totalorder %v63_v19, %v60_v18 }
  0xb9   :  { %vm78_vm3 = vcmp.eq.s32.totalorder %v77_v20, %v60_v18  ;;  %v290_v23 = vsel %vm64_vm2, 1.0, %v467_v2 }
  0xba   :  { %v292_v26 = vsel %vm78_vm3, 1.0, %v467_v2 }
  0xbc   :  { %v70_v21 = vpop.permute.xlu0 %69 }
  0xbd   :  { %v84_v22 = vpop.permute.xlu1 %83  ;;  %vm71_vm4 = vcmp.eq.s32.totalorder %v70_v21, %v60_v18 }
  0xbe   :  { %vm85_vm5 = vcmp.eq.s32.totalorder %v84_v22, %v60_v18  ;;  %v291_v24 = vsel %vm71_vm4, 1.0, %v467_v2 }
  0xbf   :  { %v74_v25 = vadd.f32 %v291_v24, %v290_v23  ;;  %v293_v27 = vsel %vm85_vm5, 1.0, %v467_v2 }
  0xc1   :  { %v81_v28 = vadd.f32 %v292_v26, %v74_v25 }
  0xc3   :  { %v88_v29 = vadd.f32 %v293_v27, %v81_v28 }
  0xc5   :  { %313 = vmatmul.mubr.msk.f32.vlgmr.msra.gmra.mrb[0].mxu0 %vm97_vm6, %v88_v29 }
 0x198   :  { %v171_v34 = vpop.f32.mrb[0].mxu0 }
 0x199   :  { %v172_v35 = vadd.f32 %v294_v33, %v171_v34  ;;  %v314_v36 = vpop.f32.mrb[1].mxu0 }
 0x19b   :  { %v175_v37 = vmax.f32 %v172_v35, 0.0 }
 0x19d   :  { %332 = vmatmul.mubr.msk.f32.vlgmr.msra.gmra.mrb[0].mxu1 %vm191_vm7, %v175_v37 }
 0x270   :  { %v261_v39 = vpop.f32.mrb[0].mxu1 }
 0x271   :  { %v262_v40 = vadd.f32 %v297_v38, %v261_v39  ;;  %v333_v41 = vpop.f32.mrb[1].mxu1 }
 0x273   :  { %v265_v42 = vmul.f32 %v262_v40, %v262_v40 }
 0x275   :  { %v267_v43 = vsel %vm266_vm8, %v265_v42, 0.0 }
 0x276   :  { %268 = vadd.xlane.f32.xlu1 %v267_v43 }
 0x303   :  { %v269_v44 = vpop.xlane.xlu1 %268 }
 0x304   :  { %v270_v45 = vmax.f32 %v269_v44, 1e-24 }
 0x306   :  { %364 = vrsqrt.f32 %v270_v45 }
 0x310   :  { %v365_v46 = vpop.eup %364 }
 0x311   :  { %v272_v47 = vmul.f32 %v365_v46, %v262_v40 }
 0x313   :  { %273 = vst [vmem:[#allocation8] sm:$0x3] %v272_v47 }
 0x314   :  { %443 = shalt.err (!%p440_p0)
}
 0x315   :  { %s444_s10 = scalar_lea.hbm %s562_s5, 32 }
 0x316   :  { %p445_p1 = scmp.ne.s32.totalorder %s562_s5, %s444_s10  ;;  %p448_p2 = scmp.lt.u32.totalorder %s444_s10, %s562_s5 }
 0x318   :  { %p450_p3 = pnand %p448_p2, %p445_p1 }
 0x31a   :  { %453 = shalt.err (!%p450_p3)
}
 0x31b   :  { %283 = dma.vmem_to_hbm [thread:$0]  %s281_s7, 32, %s562_s5, [#allocation4]  }
 0x31c   :  { %458 = dma.done.wait [#allocation4], 32  }
 0x31d   :  { %459 = vsyncadd [#allocation4], 4294967264 }
 0x31e   :  { %287 = vsyncpa [#allocation3], 1 }
 0x31f   :  { %288 = vsyncpa [#allocation6], 1 }
 0x320   :  { %289 = vsyncpa [#allocation4], 1 }

</bundles_post_ra>
